<compile_context>
chip_gen: v6e
topology: v6e:2x2x1
jax: 0.10.0
libtpu: 0.0.40
codegen_flags: <defaults>
</compile_context>

<pallas_src>
import jax
import jax.numpy as jnp
from jax.experimental import pallas as pl
from jax.experimental.pallas import tpu as pltpu


def _round_up(n, m):
    return ((n + m - 1) // m) * m


def _mlp2l_kernel(x_ref, w0_ref, dw0_ref, b0_ref, db0_ref,
                  w1_ref, dw1_ref, b1_ref, db1_ref, o_ref):
    # Effective parameters: f32 adds (v5e-safe), bf16 only for the MXU operands.
    w0 = (w0_ref[...] + dw0_ref[...]).astype(jnp.bfloat16)
    w1 = (w1_ref[...] + dw1_ref[...]).astype(jnp.bfloat16)
    b0 = b0_ref[...] + db0_ref[...]          # (1, hid_p) f32, broadcasts over rows
    b1 = b1_ref[...] + db1_ref[...]          # (1, out_p) f32

    h = jnp.dot(x_ref[...], w0, preferred_element_type=jnp.float32) + b0
    h = jnp.tanh(h)                          # act_func='tanh', f32 on EUP/VPU
    y = jnp.dot(h.astype(jnp.bfloat16), w1, preferred_element_type=jnp.float32) + b1
    o_ref[...] = y.astype(o_ref.dtype)


def dynamic_mlp2l_forward(x_list, params, d_params, *, tile_b=512):
    """x_list: list of one NCHW array. Returns [y] like the PyTorch module."""
    assert len(x_list) == 1
    x = x_list[0]
    B = x.shape[0]
    x2d = x.reshape(B, -1).astype(jnp.float32)   # torch .view(B, -1), row-major

    w0, b0, w1, b1 = params
    dw0, db0, dw1, db1 = d_params
    in_c, hid_c = w0.shape
    _, out_c = w1.shape
    assert x2d.shape[1] == in_c

    # ---- lane-dense padded dims (multiples of 128) and batch tiling -------
    in_p = _round_up(in_c, 128)
    hid_p = _round_up(hid_c, 128)
    out_p = _round_up(out_c, 128)
    TILE_B = min(tile_b, _round_up(B, 8))        # >=8 sublanes; large tiles for big B
    B_p = _round_up(B, TILE_B)
    grid = (B_p // TILE_B,)

    # ---- zero-padded operands ---------------------------------------------
    # x in bf16 (halves the dominant DMA stream); zero pad rows/cols are inert.
    x_pad = jnp.pad(x2d.astype(jnp.bfloat16), ((0, B_p - B), (0, in_p - in_c)))
    w0_p = jnp.pad(w0.astype(jnp.float32), ((0, in_p - in_c), (0, hid_p - hid_c)))
    dw0_p = jnp.pad(dw0.astype(jnp.float32), ((0, in_p - in_c), (0, hid_p - hid_c)))
    b0_p = jnp.pad(b0.astype(jnp.float32), (0, hid_p - hid_c)).reshape(1, hid_p)
    db0_p = jnp.pad(db0.astype(jnp.float32), (0, hid_p - hid_c)).reshape(1, hid_p)
    w1_p = jnp.pad(w1.astype(jnp.float32), ((0, hid_p - hid_c), (0, out_p - out_c)))
    dw1_p = jnp.pad(dw1.astype(jnp.float32), ((0, hid_p - hid_c), (0, out_p - out_c)))
    b1_p = jnp.pad(b1.astype(jnp.float32), (0, out_p - out_c)).reshape(1, out_p)
    db1_p = jnp.pad(db1.astype(jnp.float32), (0, out_p - out_c)).reshape(1, out_p)

    # ---- BlockSpecs: batch-tiled x/out, resident weights --------------------
    const2d = lambda i: (0, 0)
    in_specs = [
        pl.BlockSpec((TILE_B, in_p), lambda i: (i, 0)),     # x tile
        pl.BlockSpec((in_p, hid_p), const2d),               # w0
        pl.BlockSpec((in_p, hid_p), const2d),               # dw0
        pl.BlockSpec((1, hid_p), const2d),                  # b0
        pl.BlockSpec((1, hid_p), const2d),                  # db0
        pl.BlockSpec((hid_p, out_p), const2d),              # w1
        pl.BlockSpec((hid_p, out_p), const2d),              # dw1
        pl.BlockSpec((1, out_p), const2d),                  # b1
        pl.BlockSpec((1, out_p), const2d),                  # db1
    ]
    out_spec = pl.BlockSpec((TILE_B, out_p), lambda i: (i, 0))

    # ---- VMEM budget (double-buffered x/out tiles + resident weights) ------
    x_tile_bytes = TILE_B * in_p * 2
    out_tile_bytes = TILE_B * out_p * 4
    weight_bytes = (2 * in_p * hid_p + 2 * hid_p * out_p) * 4 \
        + (2 * hid_p + 2 * out_p) * 4
    interm_bytes = TILE_B * hid_p * 4 * 2 + (in_p * hid_p + hid_p * out_p) * 2
    vmem_need = 2 * (x_tile_bytes + out_tile_bytes) + 2 * weight_bytes + interm_bytes
    vmem_limit = int(max(16 * 1024 * 1024, min(2 * vmem_need, 48 * 1024 * 1024)))

    cost = pl.CostEstimate(
        flops=2 * B_p * in_p * hid_p + 2 * B_p * hid_p * out_p,
        transcendentals=B_p * hid_p,
        bytes_accessed=(B_p * in_p * 2 + weight_bytes + B_p * out_p * 4),
    )

    y_pad = pl.pallas_call(
        _mlp2l_kernel,
        out_shape=jax.ShapeDtypeStruct((B_p, out_p), jnp.float32),
        grid=grid,
        in_specs=in_specs,
        out_specs=out_spec,
        compiler_params=pltpu.CompilerParams(
            dimension_semantics=("parallel",),
            vmem_limit_bytes=vmem_limit,
        ),
        cost_estimate=cost,
    )(x_pad, w0_p, dw0_p, b0_p, db0_p, w1_p, dw1_p, b1_p, db1_p)

    return [y_pad[:B, :out_c]]


def _init_params(key, in_channels, hid_channels, out_channels):
    """Deterministic synthetic init (module __init__ uses zeros; small random
    values here so the kernel computes something non-trivial)."""
    k0, k1, k2, k3 = jax.random.split(key, 4)
    w0 = jax.random.normal(k0, (in_channels, hid_channels), jnp.float32) * 0.02
    b0 = jax.random.normal(k1, (hid_channels,), jnp.float32) * 0.01
    w1 = jax.random.normal(k2, (hid_channels, out_channels), jnp.float32) * 0.02
    b1 = jax.random.normal(k3, (out_channels,), jnp.float32) * 0.01
    return (w0, b0, w1, b1)


def _init_d_params(params):
    # init_d_params(): zeros_like of every parameter
    return tuple(jnp.zeros_like(p) for p in params)


if __name__ == "__main__":
    key = jax.random.PRNGKey(0)
    kx, kp, kd = jax.random.split(key, 3)

    # Small shapes: NCHW input (2, 4, 16, 16) -> flattened in_channels = 1024
    B, C, H, W = 2, 4, 16, 16
    in_channels = C * H * W
    hid_channels = 32
    out_channels = 16

    x = jax.random.normal(kx, (B, C, H, W), jnp.float32)

    params = _init_params(kp, in_channels, hid_channels, out_channels)
    d_params = _init_d_params(params)
    # give d_params a small non-zero perturbation to exercise the W + dW path
    d_keys = jax.random.split(kd, 4)
    d_params = tuple(jax.random.normal(k, p.shape, p.dtype) * 0.001
                     for k, p in zip(d_keys, params))

    out = dynamic_mlp2l_forward([x], params, d_params)
    y = jax.block_until_ready(out[0])

    # pure-JAX reference check (same bf16 operand rounding as the kernel,
    # f32 accumulation).
    w0, b0, w1, b1 = params
    dw0, db0, dw1, db1 = d_params
    x2d = x.reshape(B, -1)
    bf = lambda a: a.astype(jnp.bfloat16).astype(jnp.float32)
    h_ref = jnp.tanh(bf(x2d) @ bf(w0 + dw0) + (b0 + db0)[None, :])
    y_ref = bf(h_ref) @ bf(w1 + dw1) + (b1 + db1)[None, :]

    assert y.shape == (B, out_channels)
    assert jnp.allclose(y, y_ref, atol=2e-3, rtol=2e-3), \
        float(jnp.max(jnp.abs(y - y_ref)))

    print("KERNEL_OK")
</pallas_src>

<mosaic_0001>
module attributes {stable_mosaic.version = 11 : i64} {
  func.func @_mlp2l_kernel(%arg0: i32, %arg1: memref<8x1024xbf16, #tpu.memory_space<vmem>>, %arg2: memref<1024x128xf32, #tpu.memory_space<vmem>>, %arg3: memref<1024x128xf32, #tpu.memory_space<vmem>>, %arg4: memref<1x128xf32, #tpu.memory_space<vmem>>, %arg5: memref<1x128xf32, #tpu.memory_space<vmem>>, %arg6: memref<128x128xf32, #tpu.memory_space<vmem>>, %arg7: memref<128x128xf32, #tpu.memory_space<vmem>>, %arg8: memref<1x128xf32, #tpu.memory_space<vmem>>, %arg9: memref<1x128xf32, #tpu.memory_space<vmem>>, %arg10: memref<8x128xf32, #tpu.memory_space<vmem>>) attributes {dimension_semantics = [#tpu.dimension_semantics<parallel>], iteration_bounds = array<i64: 1>, scalar_prefetch = 0 : i64, scratch_operands = 0 : i64, tpu.core_type = #tpu.core_type<tc>, window_params = [{transform_indices = @transform_0, window_bounds = array<i64: 8, 1024>}, {pipeline_mode = #tpu.pipeline_mode<synchronous>, transform_indices = @transform_1, window_bounds = array<i64: 1024, 128>}, {pipeline_mode = #tpu.pipeline_mode<synchronous>, transform_indices = @transform_2, window_bounds = array<i64: 1024, 128>}, {pipeline_mode = #tpu.pipeline_mode<synchronous>, transform_indices = @transform_3, window_bounds = array<i64: 1, 128>}, {pipeline_mode = #tpu.pipeline_mode<synchronous>, transform_indices = @transform_4, window_bounds = array<i64: 1, 128>}, {pipeline_mode = #tpu.pipeline_mode<synchronous>, transform_indices = @transform_5, window_bounds = array<i64: 128, 128>}, {pipeline_mode = #tpu.pipeline_mode<synchronous>, transform_indices = @transform_6, window_bounds = array<i64: 128, 128>}, {pipeline_mode = #tpu.pipeline_mode<synchronous>, transform_indices = @transform_7, window_bounds = array<i64: 1, 128>}, {pipeline_mode = #tpu.pipeline_mode<synchronous>, transform_indices = @transform_8, window_bounds = array<i64: 1, 128>}, {transform_indices = @transform_9, window_bounds = array<i64: 8, 128>}]} {
    %c0 = arith.constant 0 : index
    %c0_0 = arith.constant 0 : index
    %0 = vector.load %arg2[%c0, %c0_0] : memref<1024x128xf32, #tpu.memory_space<vmem>>, vector<1024x128xf32>
    %c0_1 = arith.constant 0 : index
    %c0_2 = arith.constant 0 : index
    %1 = vector.load %arg3[%c0_1, %c0_2] : memref<1024x128xf32, #tpu.memory_space<vmem>>, vector<1024x128xf32>
    %2 = arith.addf %0, %1 : vector<1024x128xf32>
    %3 = arith.truncf %2 : vector<1024x128xf32> to vector<1024x128xbf16>
    %c0_3 = arith.constant 0 : index
    %c0_4 = arith.constant 0 : index
    %4 = vector.load %arg6[%c0_3, %c0_4] : memref<128x128xf32, #tpu.memory_space<vmem>>, vector<128x128xf32>
    %c0_5 = arith.constant 0 : index
    %c0_6 = arith.constant 0 : index
    %5 = vector.load %arg7[%c0_5, %c0_6] : memref<128x128xf32, #tpu.memory_space<vmem>>, vector<128x128xf32>
    %6 = arith.addf %4, %5 : vector<128x128xf32>
    %7 = arith.truncf %6 : vector<128x128xf32> to vector<128x128xbf16>
    %c0_7 = arith.constant 0 : index
    %c0_8 = arith.constant 0 : index
    %8 = vector.load %arg4[%c0_7, %c0_8] : memref<1x128xf32, #tpu.memory_space<vmem>>, vector<1x128xf32>
    %c0_9 = arith.constant 0 : index
    %c0_10 = arith.constant 0 : index
    %9 = vector.load %arg5[%c0_9, %c0_10] : memref<1x128xf32, #tpu.memory_space<vmem>>, vector<1x128xf32>
    %10 = arith.addf %8, %9 : vector<1x128xf32>
    %c0_11 = arith.constant 0 : index
    %c0_12 = arith.constant 0 : index
    %11 = vector.load %arg8[%c0_11, %c0_12] : memref<1x128xf32, #tpu.memory_space<vmem>>, vector<1x128xf32>
    %c0_13 = arith.constant 0 : index
    %c0_14 = arith.constant 0 : index
    %12 = vector.load %arg9[%c0_13, %c0_14] : memref<1x128xf32, #tpu.memory_space<vmem>>, vector<1x128xf32>
    %13 = arith.addf %11, %12 : vector<1x128xf32>
    %c0_15 = arith.constant 0 : index
    %c0_16 = arith.constant 0 : index
    %14 = vector.load %arg1[%c0_15, %c0_16] : memref<8x1024xbf16, #tpu.memory_space<vmem>>, vector<8x1024xbf16>
    %cst = arith.constant dense<0.000000e+00> : vector<8x128xf32>
    %15 = tpu.matmul %14, %3, %cst {dimension_numbers = #tpu.dot_dimension_numbers<[1], [0], [0], [1], [0, 0, 1, 1], [], []>} : vector<8x1024xbf16>, vector<1024x128xbf16>, vector<8x128xf32> -> vector<8x128xf32>
    %16 = vector.broadcast %10 : vector<1x128xf32> to vector<8x128xf32>
    %17 = arith.addf %15, %16 : vector<8x128xf32>
    %18 = math.tanh %17 : vector<8x128xf32>
    %19 = arith.truncf %18 : vector<8x128xf32> to vector<8x128xbf16>
    %cst_17 = arith.constant dense<0.000000e+00> : vector<8x128xf32>
    %20 = tpu.matmul %19, %7, %cst_17 {dimension_numbers = #tpu.dot_dimension_numbers<[1], [0], [0], [1], [0, 0, 1, 1], [], []>} : vector<8x128xbf16>, vector<128x128xbf16>, vector<8x128xf32> -> vector<8x128xf32>
    %21 = vector.broadcast %13 : vector<1x128xf32> to vector<8x128xf32>
    %22 = arith.addf %20, %21 : vector<8x128xf32>
    %c0_18 = arith.constant 0 : index
    %c0_19 = arith.constant 0 : index
    %23 = vector.load %arg10[%c0_18, %c0_19] : memref<8x128xf32, #tpu.memory_space<vmem>>, vector<8x128xf32>
    tpu.vector_store %arg10[%c0_18, %c0_19], %22 {strides = array<i32>} : memref<8x128xf32, #tpu.memory_space<vmem>>, vector<8x128xf32>,
    return
  }
  func.func @transform_0(%arg0: i32) -> (i32, i32) {
    %c0_i32 = arith.constant 0 : i32
    %c0_i32_0 = arith.constant 0 : i32
    return %arg0, %c0_i32 : i32, i32
  }
  func.func @transform_1(%arg0: i32) -> (i32, i32) {
    %c0_i32 = arith.constant 0 : i32
    %c0_i32_0 = arith.constant 0 : i32
    %c0_i32_1 = arith.constant 0 : i32
    return %c0_i32, %c0_i32_0 : i32, i32
  }
  func.func @transform_2(%arg0: i32) -> (i32, i32) {
    %c0_i32 = arith.constant 0 : i32
    %c0_i32_0 = arith.constant 0 : i32
    %c0_i32_1 = arith.constant 0 : i32
    return %c0_i32, %c0_i32_0 : i32, i32
  }
  func.func @transform_3(%arg0: i32) -> (i32, i32) {
    %c0_i32 = arith.constant 0 : i32
    %c0_i32_0 = arith.constant 0 : i32
    %c0_i32_1 = arith.constant 0 : i32
    return %c0_i32, %c0_i32_0 : i32, i32
  }
  func.func @transform_4(%arg0: i32) -> (i32, i32) {
    %c0_i32 = arith.constant 0 : i32
    %c0_i32_0 = arith.constant 0 : i32
    %c0_i32_1 = arith.constant 0 : i32
    return %c0_i32, %c0_i32_0 : i32, i32
  }
  func.func @transform_5(%arg0: i32) -> (i32, i32) {
    %c0_i32 = arith.constant 0 : i32
    %c0_i32_0 = arith.constant 0 : i32
    %c0_i32_1 = arith.constant 0 : i32
    return %c0_i32, %c0_i32_0 : i32, i32
  }
  func.func @transform_6(%arg0: i32) -> (i32, i32) {
    %c0_i32 = arith.constant 0 : i32
    %c0_i32_0 = arith.constant 0 : i32
    %c0_i32_1 = arith.constant 0 : i32
    return %c0_i32, %c0_i32_0 : i32, i32
  }
  func.func @transform_7(%arg0: i32) -> (i32, i32) {
    %c0_i32 = arith.constant 0 : i32
    %c0_i32_0 = arith.constant 0 : i32
    %c0_i32_1 = arith.constant 0 : i32
    return %c0_i32, %c0_i32_0 : i32, i32
  }
  func.func @transform_8(%arg0: i32) -> (i32, i32) {
    %c0_i32 = arith.constant 0 : i32
    %c0_i32_0 = arith.constant 0 : i32
    %c0_i32_1 = arith.constant 0 : i32
    return %c0_i32, %c0_i32_0 : i32, i32
  }
  func.func @transform_9(%arg0: i32) -> (i32, i32) {
    %c0_i32 = arith.constant 0 : i32
    %c0_i32_0 = arith.constant 0 : i32
    return %arg0, %c0_i32 : i32, i32
  }
}

</mosaic_0001>

<bundles_post_ra>
// kernel: tpu_custom_call.1
= control target key start
LH: loop header
LB: loop body
LE: loop exit
PB: predicated region body
PF: predicated region fallthrough
CT: control target
= control target key end

     0   :  { %14 = vsyncpa [#allocation3], 0  ;;  %s1258_s0 = inlined_call_operand.hbm [shape: bf16[8,1024], index: 0, kind: input, shape index: {}]   ;;  %s1259_s1 = inlined_call_operand.hbm [shape: f32[1024,128], index: 1, kind: input, shape index: {}]   ;;  %s1260_s2 = inlined_call_operand.hbm [shape: f32[1024,128], index: 2, kind: input, shape index: {}]   ;;  %s1261_s3 = inlined_call_operand.vmem [shape: f32[1,128], index: 3, kind: input, shape index: {}]   ;;  %s1262_s4 = inlined_call_operand.vmem [shape: f32[1,128], index: 4, kind: input, shape index: {}]   ;;  %s1263_s5 = inlined_call_operand.hbm [shape: f32[128,128], index: 5, kind: input, shape index: {}]   ;;  %s1264_s6 = inlined_call_operand.hbm [shape: f32[128,128], index: 6, kind: input, shape index: {}]   ;;  %s1265_s7 = inlined_call_operand.vmem [shape: f32[1,128], index: 7, kind: input, shape index: {}]   ;;  %s1266_s8 = inlined_call_operand.vmem [shape: f32[1,128], index: 8, kind: input, shape index: {}]   ;;  %s1267_s9 = inlined_call_operand.hbm [shape: f32[8,128], index: 9, kind: output, shape index: {}]  }
   0x1   :  { %15 = vsyncpa [#allocation6], 0 }
   0x2   :  { %16 = vsyncpa [#allocation9], 0 }
   0x3   :  { %17 = vsyncpa [#allocation4], 0  ;;  %s1147_s30 = smov [#allocation5]  }
   0x4   :  { %s33_s10 = sshll.u32 %s1147_s30, 4  ;;  %s34_s10 = int_to_ptr.vmem [resolvable:$true] %s33_s10 }
   0x5   :  { %s1027_s11 = scalar_lea.vmem %s34_s10, 16384  ;;  %p1032_p1 = scmp.lt.s32.totalorder %s34_s10, %s34_s10 }
   0x6   :  { %p1028_p0 = scmp.ne.s32.totalorder %s34_s10, %s1027_s11  ;;  %p1033_p2 = scmp.lt.s32.totalorder %s1027_s11, %s1027_s11 }
   0x8   :  { %p1034_p3 = por %p1033_p2, %p1032_p1 }
   0xa   :  { %p1035_p4 = pnand %p1034_p3, %p1028_p0 }
   0xc   :  { %1038 = shalt.err (!%p1035_p4)
}
   0xd   :  { %s1148_s12 = smov 128   ;;  %s1149_s13 = smov 8  }
   0xe   :  { %39 = dma.hbm_to_vmem [thread:$0]  %s1259_s1, 16384, %s34_s10, [#allocation6], %s1148_s12, %s1148_s12, %s1149_s13  }
   0xf   :  { %s1150_s16 = smov [#allocation8]   ;;  %s1151_s18 = smov [#allocation2]  }
  0x10   :  { %s61_s17 = sshll.u32 %s1150_s16, 4  ;;  %s24_s19 = sshll.u32 %s1151_s18, 4  ;;  %s62_s17 = int_to_ptr.vmem [resolvable:$true] %s61_s17  ;;  %s25_s19 = int_to_ptr.vmem [resolvable:$true] %s24_s19 }
  0x11   :  { %s1047_s20 = scalar_lea.vmem %s62_s17, 2048  ;;  %p1052_p6 = scmp.lt.s32.totalorder %s62_s17, %s62_s17 }
  0x12   :  { %p1048_p5 = scmp.ne.s32.totalorder %s62_s17, %s1047_s20  ;;  %p1053_p7 = scmp.lt.s32.totalorder %s1047_s20, %s1047_s20 }
  0x14   :  { %p1054_p8 = por %p1053_p7, %p1052_p6 }
  0x16   :  { %p1055_p9 = pnand %p1054_p8, %p1048_p5 }
  0x18   :  { %1058 = shalt.err (!%p1055_p9)
}
  0x19   :  { %67 = dma.hbm_to_vmem [thread:$0]  %s1263_s5, 2048, %s62_s17, [#allocation9], %s1148_s12, %s1148_s12, %s1149_s13  }
  0x1a   :  { %s1067_s1 = scalar_lea.vmem %s25_s19, 512  ;;  %p1072_p11 = scmp.lt.s32.totalorder %s25_s19, %s25_s19 }
  0x1b   :  { %p1068_p10 = scmp.ne.s32.totalorder %s25_s19, %s1067_s1  ;;  %p1073_p12 = scmp.lt.s32.totalorder %s1067_s1, %s1067_s1 }
  0x1d   :  { %p1074_p13 = por %p1073_p12, %p1072_p11 }
  0x1f   :  { %p1075_p0 = pnand %p1074_p13, %p1068_p10 }
  0x21   :  { %1078 = shalt.err (!%p1075_p0)
}
  0x22   :  { %27 = dma.hbm_to_vmem [thread:$0]  %s1258_s0, 512, %s25_s19, [#allocation3]  }
  0x23   :  { %s1152_s25 = smov [#allocation7]   ;;  %s1153_s27 = smov [#allocation10]  }
  0x24   :  { %s45_s26 = sshll.u32 %s1152_s25, 4  ;;  %s73_s28 = sshll.u32 %s1153_s27, 4  ;;  %s46_s26 = int_to_ptr.vmem [resolvable:$true] %s45_s26  ;;  %s74_s28 = int_to_ptr.vmem [resolvable:$true] %s73_s28 }
  0x25   :  { %s1087_s29 = scalar_lea.vmem %s46_s26, 16384  ;;  %p1092_p2 = scmp.lt.s32.totalorder %s46_s26, %s46_s26 }
  0x26   :  { %p1088_p1 = scmp.ne.s32.totalorder %s46_s26, %s1087_s29  ;;  %p1093_p3 = scmp.lt.s32.totalorder %s1087_s29, %s1087_s29 }
  0x28   :  { %p1094_p4 = por %p1093_p3, %p1092_p2 }
  0x2a   :  { %p1095_p5 = pnand %p1094_p4, %p1088_p1 }
  0x2c   :  { %1098 = shalt.err (!%p1095_p5)
}
  0x2d   :  { %51 = dma.hbm_to_vmem [thread:$0]  %s1260_s2, 16384, %s46_s26, [#allocation6], %s1148_s12, %s1148_s12, %s1149_s13  }
  0x2e   :  { %s1107_s0 = scalar_lea.vmem %s74_s28, 2048  ;;  %p1112_p7 = scmp.lt.s32.totalorder %s74_s28, %s74_s28 }
  0x2f   :  { %p1108_p6 = scmp.ne.s32.totalorder %s74_s28, %s1107_s0  ;;  %p1113_p8 = scmp.lt.s32.totalorder %s1107_s0, %s1107_s0 }
  0x31   :  { %p1114_p9 = por %p1113_p8, %p1112_p7 }
  0x33   :  { %p1115_p10 = pnand %p1114_p9, %p1108_p6 }
  0x35   :  { %1118 = shalt.err (!%p1115_p10)
}
  0x36   :  { %79 = dma.hbm_to_vmem [thread:$0]  %s1264_s6, 2048, %s74_s28, [#allocation9], %s1148_s12, %s1148_s12, %s1149_s13  }
  0x37   :  { %1139 = dma.done.wait [#allocation3], 512  }
  0x38   :  { %1140 = vsyncadd [#allocation3], 4294966784 }
  0x39   :  { %1141 = dma.done.wait [#allocation6], 32768  }
  0x3a   :  { %1142 = vsyncadd [#allocation6], 4294934528 }
  0x3b   :  { %1143 = dma.done.wait [#allocation9], 4096  }
  0x3c   :  { %1144 = vsyncadd [#allocation9], 4294963200  ;;  %v130_v0 = vld [vmem:[#allocation5 + $0xf0] sm:$0xff]  ;;  %v131_v1 = vld [vmem:[#allocation5 + $0xf8] sm:$0xff]  ;;  %vm1155_vm0 = vmmov 0   ;;  %s1156_s16 = smov [#allocation11]  }
  0x3d   :  { %v258_v2 = vld [vmem:[#allocation7 + $0xf0] sm:$0xff]  ;;  %v259_v3 = vld [vmem:[#allocation7 + $0xf8] sm:$0xff]  ;;  %v128_v25 = vld [vmem:[#allocation5 + $0xe0] sm:$0xff]  ;;  %s863_s17 = sshll.u32 %s1156_s16, 4  ;;  %s864_s17 = int_to_ptr.vmem [resolvable:$true] %s863_s17 }
  0x3e   :  { %v386_v4 = vadd.f32 %v258_v2, %v130_v0  ;;  %v162_v5 = vld [vmem:[#allocation5 + $0x1f0] sm:$0xff]  ;;  %v163_v6 = vld [vmem:[#allocation5 + $0x1f8] sm:$0xff]  ;;  %v387_v7 = vadd.f32 %v259_v3, %v131_v1  ;;  %v129_v26 = vld [vmem:[#allocation5 + $0xe8] sm:$0xff]  ;;  %s1119_s18 = scalar_lea.vmem %s864_s17, 128  ;;  %p1124_p12 = scmp.lt.s32.totalorder %s864_s17, %s864_s17 }
  0x3f   :  { %v290_v8 = vld [vmem:[#allocation7 + $0x1f0] sm:$0xff]  ;;  %v291_v9 = vld [vmem:[#allocation7 + $0x1f8] sm:$0xff]  ;;  %v256_v29 = vld [vmem:[#allocation7 + $0xe0] sm:$0xff]  ;;  %p1120_p11 = scmp.ne.s32.totalorder %s864_s17, %s1119_s18  ;;  %p1125_p13 = scmp.lt.s32.totalorder %s1119_s18, %s1119_s18 }
  0x40   :  { %v114_v10 = vld [vmem:[#allocation5 + $0x70] sm:$0xff]  ;;  %v418_v11 = vadd.f32 %v290_v8, %v162_v5  ;;  %v419_v12 = vadd.f32 %v291_v9, %v163_v6  ;;  %v115_v13 = vld [vmem:[#allocation5 + $0x78] sm:$0xff]  ;;  %v499_v16 = vpack.c.bf16 %v387_v7, %v386_v4  ;;  %v257_v30 = vld [vmem:[#allocation7 + $0xe8] sm:$0xff]  ;;  %v384_v32 = vadd.f32 %v256_v29, %v128_v25 }
  0x41   :  { %v242_v14 = vld [vmem:[#allocation7 + $0x70] sm:$0xff]  ;;  %v243_v15 = vld [vmem:[#allocation7 + $0x78] sm:$0xff]  ;;  %v160_v31 = vld [vmem:[#allocation5 + $0x1e0] sm:$0xff]  ;;  %v385_v33 = vadd.f32 %v257_v30, %v129_v26  ;;  %p1126_p0 = por %p1125_p13, %p1124_p12 }
  0x42   :  { %v370_v17 = vadd.f32 %v242_v14, %v114_v10  ;;  %v371_v18 = vadd.f32 %v243_v15, %v115_v13  ;;  %v146_v19 = vld [vmem:[#allocation5 + $0x170] sm:$0xff]  ;;  %v147_v20 = vld [vmem:[#allocation5 + $0x178] sm:$0xff]  ;;  %v515_v22 = vpack.c.bf16 %v419_v12, %v418_v11  ;;  %882 = vmatprep.subr.bf16.mxu0 %v499_v16  ;;  %v161_v34 = vld [vmem:[#allocation5 + $0x1e8] sm:$0xff] }
  0x43   :  { %v274_v21 = vld [vmem:[#allocation7 + $0x170] sm:$0xff]  ;;  %v275_v23 = vld [vmem:[#allocation7 + $0x178] sm:$0xff]  ;;  %v288_v35 = vld [vmem:[#allocation7 + $0x1e0] sm:$0xff]  ;;  %v498_v43 = vpack.c.bf16 %v385_v33, %v384_v32  ;;  %p1127_p1 = pnand %p1126_p0, %p1120_p11 }
  0x44   :  { %v402_v24 = vadd.f32 %v274_v21, %v146_v19  ;;  %v491_v27 = vpack.c.bf16 %v371_v18, %v370_v17  ;;  %v403_v28 = vadd.f32 %v275_v23, %v147_v20  ;;  %904 = vmatprep.subr.bf16.mxu1 %v515_v22  ;;  %v289_v36 = vld [vmem:[#allocation7 + $0x1e8] sm:$0xff]  ;;  %v416_v38 = vadd.f32 %v288_v35, %v160_v31  ;;  %v112_v40 = vld [vmem:[#allocation5 + $0x60] sm:$0xff]  ;;  %v126_v52 = vld [vmem:[#allocation5 + $0xd0] sm:$0xff] }
  0x45   :  { %v417_v39 = vadd.f32 %v289_v36, %v161_v34  ;;  %v113_v41 = vld [vmem:[#allocation5 + $0x68] sm:$0xff]  ;;  %v240_v42 = vld [vmem:[#allocation7 + $0x60] sm:$0xff]  ;;  %v127_v55 = vld [vmem:[#allocation5 + $0xd8] sm:$0xff] }
  0x46   :  { %883 = vmatpush3.bf16.msra.mxu0 %v491_v27  ;;  %v507_v37 = vpack.c.bf16 %v403_v28, %v402_v24  ;;  %v241_v44 = vld [vmem:[#allocation7 + $0x68] sm:$0xff]  ;;  %v368_v45 = vadd.f32 %v240_v42, %v112_v40  ;;  %v144_v46 = vld [vmem:[#allocation5 + $0x160] sm:$0xff]  ;;  %v254_v56 = vld [vmem:[#allocation7 + $0xd0] sm:$0xff] }
  0x47   :  { %v145_v47 = vld [vmem:[#allocation5 + $0x168] sm:$0xff]  ;;  %v514_v48 = vpack.c.bf16 %v417_v39, %v416_v38  ;;  %v369_v49 = vadd.f32 %v241_v44, %v113_v41  ;;  %v272_v50 = vld [vmem:[#allocation7 + $0x160] sm:$0xff]  ;;  %884 = vmatprep.subr.bf16.mxu0 %v498_v43  ;;  %v255_v57 = vld [vmem:[#allocation7 + $0xd8] sm:$0xff]  ;;  %v382_v59 = vadd.f32 %v254_v56, %v126_v52 }
  0x48   :  { %905 = vmatpush3.bf16.msra.mxu1 %v507_v37  ;;  %v273_v51 = vld [vmem:[#allocation7 + $0x168] sm:$0xff]  ;;  %v400_v53 = vadd.f32 %v272_v50, %v144_v46  ;;  %v383_v60 = vadd.f32 %v255_v57, %v127_v55  ;;  %v158_v61 = vld [vmem:[#allocation5 + $0x1d0] sm:$0xff]  ;;  %v159_v62 = vld [vmem:[#allocation5 + $0x1d8] sm:$0xff] }
  0x49   :  { %v401_v54 = vadd.f32 %v273_v51, %v145_v47  ;;  %906 = vmatprep.subr.bf16.mxu1 %v514_v48  ;;  %v490_v58 = vpack.c.bf16 %v369_v49, %v368_v45  ;;  %v286_v63 = vld [vmem:[#allocation7 + $0x1d0] sm:$0xff]  ;;  %v287_v1 = vld [vmem:[#allocation7 + $0x1d8] sm:$0xff]  ;;  %v124_v18 = vld [vmem:[#allocation5 + $0xc0] sm:$0xff] }
  0x4a   :  { %v414_v2 = vadd.f32 %v286_v63, %v158_v61  ;;  %v110_v3 = vld [vmem:[#allocation5 + $0x50] sm:$0xff]  ;;  %v111_v4 = vld [vmem:[#allocation5 + $0x58] sm:$0xff]  ;;  %v497_v5 = vpack.c.bf16 %v383_v60, %v382_v59  ;;  %v415_v6 = vadd.f32 %v287_v1, %v159_v62  ;;  %v125_v19 = vld [vmem:[#allocation5 + $0xc8] sm:$0xff] }
  0x4b   :  { %v506_v0 = vpack.c.bf16 %v401_v54, %v400_v53  ;;  %885 = vmatpush3.bf16.msra.mxu0 %v490_v58  ;;  %v238_v7 = vld [vmem:[#allocation7 + $0x50] sm:$0xff]  ;;  %v239_v8 = vld [vmem:[#allocation7 + $0x58] sm:$0xff]  ;;  %v252_v20 = vld [vmem:[#allocation7 + $0xc0] sm:$0xff] }
  0x4c   :  { %v142_v9 = vld [vmem:[#allocation5 + $0x150] sm:$0xff]  ;;  %v366_v10 = vadd.f32 %v238_v7, %v110_v3  ;;  %v367_v11 = vadd.f32 %v239_v8, %v111_v4  ;;  %v143_v12 = vld [vmem:[#allocation5 + $0x158] sm:$0xff]  ;;  %886 = vmatprep.subr.bf16.mxu0 %v497_v5  ;;  %v513_v15 = vpack.c.bf16 %v415_v6, %v414_v2  ;;  %v253_v22 = vld [vmem:[#allocation7 + $0xc8] sm:$0xff]  ;;  %v380_v23 = vadd.f32 %v252_v20, %v124_v18 }
  0x4d   :  { %907 = vmatpush3.bf16.msra.mxu1 %v506_v0  ;;  %v270_v13 = vld [vmem:[#allocation7 + $0x150] sm:$0xff]  ;;  %v271_v14 = vld [vmem:[#allocation7 + $0x158] sm:$0xff]  ;;  %v156_v24 = vld [vmem:[#allocation5 + $0x1c0] sm:$0xff]  ;;  %v381_v27 = vadd.f32 %v253_v22, %v125_v19 }
  0x4e   :  { %v398_v16 = vadd.f32 %v270_v13, %v142_v9  ;;  %v399_v17 = vadd.f32 %v271_v14, %v143_v12  ;;  %v489_v21 = vpack.c.bf16 %v367_v11, %v366_v10  ;;  %v157_v25 = vld [vmem:[#allocation5 + $0x1c8] sm:$0xff]  ;;  %908 = vmatprep.subr.bf16.mxu1 %v513_v15  ;;  %v284_v28 = vld [vmem:[#allocation7 + $0x1c0] sm:$0xff]  ;;  %v122_v45 = vld [vmem:[#allocation5 + $0xb0] sm:$0xff] }
  0x4f   :  { %v285_v29 = vld [vmem:[#allocation7 + $0x1c8] sm:$0xff]  ;;  %v108_v30 = vld [vmem:[#allocation5 + $0x40] sm:$0xff]  ;;  %v412_v31 = vadd.f32 %v284_v28, %v156_v24  ;;  %v496_v36 = vpack.c.bf16 %v381_v27, %v380_v23  ;;  %v123_v46 = vld [vmem:[#allocation5 + $0xb8] sm:$0xff] }
  0x50   :  { %v505_v26 = vpack.c.bf16 %v399_v17, %v398_v16  ;;  %887 = vmatpush3.bf16.msra.mxu0 %v489_v21  ;;  %v413_v32 = vadd.f32 %v285_v29, %v157_v25  ;;  %v109_v33 = vld [vmem:[#allocation5 + $0x48] sm:$0xff]  ;;  %v236_v34 = vld [vmem:[#allocation7 + $0x40] sm:$0xff]  ;;  %v250_v49 = vld [vmem:[#allocation7 + $0xb0] sm:$0xff] }
  0x51   :  { %v237_v35 = vld [vmem:[#allocation7 + $0x48] sm:$0xff]  ;;  %v364_v37 = vadd.f32 %v236_v34, %v108_v30  ;;  %v140_v39 = vld [vmem:[#allocation5 + $0x140] sm:$0xff]  ;;  %888 = vmatprep.subr.bf16.mxu0 %v496_v36  ;;  %v251_v50 = vld [vmem:[#allocation7 + $0xb8] sm:$0xff]  ;;  %v378_v52 = vadd.f32 %v250_v49, %v122_v45 }
  0x52   :  { %909 = vmatpush3.bf16.msra.mxu1 %v505_v26  ;;  %v365_v38 = vadd.f32 %v237_v35, %v109_v33  ;;  %v141_v40 = vld [vmem:[#allocation5 + $0x148] sm:$0xff]  ;;  %v268_v41 = vld [vmem:[#allocation7 + $0x140] sm:$0xff]  ;;  %v512_v42 = vpack.c.bf16 %v413_v32, %v412_v31  ;;  %v154_v51 = vld [vmem:[#allocation5 + $0x1b0] sm:$0xff]  ;;  %v379_v53 = vadd.f32 %v251_v50, %v123_v46 }
  0x53   :  { %v269_v43 = vld [vmem:[#allocation7 + $0x148] sm:$0xff]  ;;  %v396_v44 = vadd.f32 %v268_v41, %v140_v39  ;;  %v155_v54 = vld [vmem:[#allocation5 + $0x1b8] sm:$0xff]  ;;  %v282_v55 = vld [vmem:[#allocation7 + $0x1b0] sm:$0xff] }
  0x54   :  { %v488_v47 = vpack.c.bf16 %v365_v38, %v364_v37  ;;  %v397_v48 = vadd.f32 %v269_v43, %v141_v40  ;;  %910 = vmatprep.subr.bf16.mxu1 %v512_v42  ;;  %v283_v56 = vld [vmem:[#allocation7 + $0x1b8] sm:$0xff]  ;;  %v410_v58 = vadd.f32 %v282_v55, %v154_v51  ;;  %v106_v60 = vld [vmem:[#allocation5 + $0x30] sm:$0xff]  ;;  %v495_v63 = vpack.c.bf16 %v379_v53, %v378_v52  ;;  %v120_v8 = vld [vmem:[#allocation5 + $0xa0] sm:$0xff] }
  0x55   :  { %v411_v59 = vadd.f32 %v283_v56, %v155_v54  ;;  %v107_v61 = vld [vmem:[#allocation5 + $0x38] sm:$0xff]  ;;  %v234_v62 = vld [vmem:[#allocation7 + $0x30] sm:$0xff]  ;;  %v121_v11 = vld [vmem:[#allocation5 + $0xa8] sm:$0xff] }
  0x56   :  { %889 = vmatpush3.bf16.msra.mxu0 %v488_v47  ;;  %v504_v57 = vpack.c.bf16 %v397_v48, %v396_v44  ;;  %v235_v0 = vld [vmem:[#allocation7 + $0x38] sm:$0xff]  ;;  %v362_v1 = vadd.f32 %v234_v62, %v106_v60  ;;  %v138_v2 = vld [vmem:[#allocation5 + $0x130] sm:$0xff]  ;;  %v248_v12 = vld [vmem:[#allocation7 + $0xa0] sm:$0xff] }
  0x57   :  { %v139_v3 = vld [vmem:[#allocation5 + $0x138] sm:$0xff]  ;;  %v511_v4 = vpack.c.bf16 %v411_v59, %v410_v58  ;;  %v363_v5 = vadd.f32 %v235_v0, %v107_v61  ;;  %v266_v6 = vld [vmem:[#allocation7 + $0x130] sm:$0xff]  ;;  %890 = vmatprep.subr.bf16.mxu0 %v495_v63  ;;  %v249_v13 = vld [vmem:[#allocation7 + $0xa8] sm:$0xff]  ;;  %v376_v15 = vadd.f32 %v248_v12, %v120_v8 }
  0x58   :  { %911 = vmatpush3.bf16.msra.mxu1 %v504_v57  ;;  %v267_v7 = vld [vmem:[#allocation7 + $0x138] sm:$0xff]  ;;  %v394_v9 = vadd.f32 %v266_v6, %v138_v2  ;;  %v377_v16 = vadd.f32 %v249_v13, %v121_v11  ;;  %v152_v17 = vld [vmem:[#allocation5 + $0x1a0] sm:$0xff]  ;;  %v153_v18 = vld [vmem:[#allocation5 + $0x1a8] sm:$0xff] }
  0x59   :  { %v395_v10 = vadd.f32 %v267_v7, %v139_v3  ;;  %912 = vmatprep.subr.bf16.mxu1 %v511_v4  ;;  %v487_v14 = vpack.c.bf16 %v363_v5, %v362_v1  ;;  %v280_v19 = vld [vmem:[#allocation7 + $0x1a0] sm:$0xff]  ;;  %v281_v21 = vld [vmem:[#allocation7 + $0x1a8] sm:$0xff]  ;;  %v118_v38 = vld [vmem:[#allocation5 + $0x90] sm:$0xff] }
  0x5a   :  { %v408_v22 = vadd.f32 %v280_v19, %v152_v17  ;;  %v104_v23 = vld [vmem:[#allocation5 + $0x20] sm:$0xff]  ;;  %v105_v24 = vld [vmem:[#allocation5 + $0x28] sm:$0xff]  ;;  %v494_v25 = vpack.c.bf16 %v377_v16, %v376_v15  ;;  %v409_v26 = vadd.f32 %v281_v21, %v153_v18  ;;  %v119_v39 = vld [vmem:[#allocation5 + $0x98] sm:$0xff] }
  0x5b   :  { %v503_v20 = vpack.c.bf16 %v395_v10, %v394_v9  ;;  %891 = vmatpush3.bf16.msra.mxu0 %v487_v14  ;;  %v232_v27 = vld [vmem:[#allocation7 + $0x20] sm:$0xff]  ;;  %v233_v28 = vld [vmem:[#allocation7 + $0x28] sm:$0xff]  ;;  %v246_v40 = vld [vmem:[#allocation7 + $0x90] sm:$0xff] }
  0x5c   :  { %v136_v29 = vld [vmem:[#allocation5 + $0x120] sm:$0xff]  ;;  %v360_v30 = vadd.f32 %v232_v27, %v104_v23  ;;  %v361_v31 = vadd.f32 %v233_v28, %v105_v24  ;;  %v137_v32 = vld [vmem:[#allocation5 + $0x128] sm:$0xff]  ;;  %892 = vmatprep.subr.bf16.mxu0 %v494_v25  ;;  %v510_v35 = vpack.c.bf16 %v409_v26, %v408_v22  ;;  %v247_v42 = vld [vmem:[#allocation7 + $0x98] sm:$0xff]  ;;  %v374_v43 = vadd.f32 %v246_v40, %v118_v38 }
  0x5d   :  { %913 = vmatpush3.bf16.msra.mxu1 %v503_v20  ;;  %v264_v33 = vld [vmem:[#allocation7 + $0x120] sm:$0xff]  ;;  %v265_v34 = vld [vmem:[#allocation7 + $0x128] sm:$0xff]  ;;  %v150_v44 = vld [vmem:[#allocation5 + $0x190] sm:$0xff]  ;;  %v375_v47 = vadd.f32 %v247_v42, %v119_v39 }
  0x5e   :  { %v392_v36 = vadd.f32 %v264_v33, %v136_v29  ;;  %v393_v37 = vadd.f32 %v265_v34, %v137_v32  ;;  %v486_v41 = vpack.c.bf16 %v361_v31, %v360_v30  ;;  %v151_v45 = vld [vmem:[#allocation5 + $0x198] sm:$0xff]  ;;  %914 = vmatprep.subr.bf16.mxu1 %v510_v35  ;;  %v278_v48 = vld [vmem:[#allocation7 + $0x190] sm:$0xff]  ;;  %v116_v1 = vld [vmem:[#allocation5 + $0x80] sm:$0xff] }
  0x5f   :  { %v279_v49 = vld [vmem:[#allocation7 + $0x198] sm:$0xff]  ;;  %v102_v50 = vld [vmem:[#allocation5 + $0x10] sm:$0xff]  ;;  %v406_v51 = vadd.f32 %v278_v48, %v150_v44  ;;  %v493_v56 = vpack.c.bf16 %v375_v47, %v374_v43  ;;  %v117_v2 = vld [vmem:[#allocation5 + $0x88] sm:$0xff] }
  0x60   :  { %v502_v46 = vpack.c.bf16 %v393_v37, %v392_v36  ;;  %893 = vmatpush3.bf16.msra.mxu0 %v486_v41  ;;  %v407_v52 = vadd.f32 %v279_v49, %v151_v45  ;;  %v103_v53 = vld [vmem:[#allocation5 + $0x18] sm:$0xff]  ;;  %v230_v54 = vld [vmem:[#allocation7 + $0x10] sm:$0xff]  ;;  %v244_v5 = vld [vmem:[#allocation7 + $0x80] sm:$0xff] }
  0x61   :  { %v231_v55 = vld [vmem:[#allocation7 + $0x18] sm:$0xff]  ;;  %v358_v57 = vadd.f32 %v230_v54, %v102_v50  ;;  %v134_v59 = vld [vmem:[#allocation5 + $0x110] sm:$0xff]  ;;  %894 = vmatprep.subr.bf16.mxu0 %v493_v56  ;;  %v245_v6 = vld [vmem:[#allocation7 + $0x88] sm:$0xff]  ;;  %v372_v8 = vadd.f32 %v244_v5, %v116_v1 }
  0x62   :  { %915 = vmatpush3.bf16.msra.mxu1 %v502_v46  ;;  %v359_v58 = vadd.f32 %v231_v55, %v103_v53  ;;  %v135_v60 = vld [vmem:[#allocation5 + $0x118] sm:$0xff]  ;;  %v262_v61 = vld [vmem:[#allocation7 + $0x110] sm:$0xff]  ;;  %v509_v62 = vpack.c.bf16 %v407_v52, %v406_v51  ;;  %v148_v7 = vld [vmem:[#allocation5 + $0x180] sm:$0xff]  ;;  %v373_v9 = vadd.f32 %v245_v6, %v117_v2 }
  0x63   :  { %v263_v63 = vld [vmem:[#allocation7 + $0x118] sm:$0xff]  ;;  %v390_v0 = vadd.f32 %v262_v61, %v134_v59  ;;  %v149_v10 = vld [vmem:[#allocation5 + $0x188] sm:$0xff]  ;;  %v276_v11 = vld [vmem:[#allocation7 + $0x180] sm:$0xff] }
  0x64   :  { %v485_v3 = vpack.c.bf16 %v359_v58, %v358_v57  ;;  %v391_v4 = vadd.f32 %v263_v63, %v135_v60  ;;  %916 = vmatprep.subr.bf16.mxu1 %v509_v62  ;;  %v277_v12 = vld [vmem:[#allocation7 + $0x188] sm:$0xff]  ;;  %v404_v14 = vadd.f32 %v276_v11, %v148_v7  ;;  %v100_v16 = vld [vmem:[#allocation5] sm:$0xff]  ;;  %v492_v19 = vpack.c.bf16 %v373_v9, %v372_v8  ;;  %v194_v33 = vld [vmem:[#allocation5 + $0x2f0] sm:$0xff] }
  0x65   :  { %v405_v15 = vadd.f32 %v277_v12, %v149_v10  ;;  %v101_v17 = vld [vmem:[#allocation5 + $0x8] sm:$0xff]  ;;  %v228_v18 = vld [vmem:[#allocation7] sm:$0xff]  ;;  %v195_v34 = vld [vmem:[#allocation5 + $0x2f8] sm:$0xff] }
  0x66   :  { %895 = vmatpush3.bf16.msra.mxu0 %v485_v3  ;;  %v501_v13 = vpack.c.bf16 %v391_v4, %v390_v0  ;;  %v229_v20 = vld [vmem:[#allocation7 + $0x8] sm:$0xff]  ;;  %v356_v21 = vadd.f32 %v228_v18, %v100_v16  ;;  %v132_v22 = vld [vmem:[#allocation5 + $0x100] sm:$0xff]  ;;  %v322_v37 = vld [vmem:[#allocation7 + $0x2f0] sm:$0xff] }
  0x67   :  { %v133_v23 = vld [vmem:[#allocation5 + $0x108] sm:$0xff]  ;;  %v508_v24 = vpack.c.bf16 %v405_v15, %v404_v14  ;;  %v357_v25 = vadd.f32 %v229_v20, %v101_v17  ;;  %v260_v26 = vld [vmem:[#allocation7 + $0x100] sm:$0xff]  ;;  %896 = vmatprep.subr.bf16.mxu0 %v492_v19  ;;  %v323_v38 = vld [vmem:[#allocation7 + $0x2f8] sm:$0xff]  ;;  %v450_v42 = vadd.f32 %v322_v37, %v194_v33 }
  0x68   :  { %917 = vmatpush3.bf16.msra.mxu1 %v501_v13  ;;  %v261_v27 = vld [vmem:[#allocation7 + $0x108] sm:$0xff]  ;;  %v610_v28 = vld [vmem:[#allocation2] sm:$0xff]  ;;  %v388_v29 = vadd.f32 %v260_v26, %v132_v22  ;;  %v226_v39 = vld [vmem:[#allocation5 + $0x3f0] sm:$0xff]  ;;  %v451_v43 = vadd.f32 %v323_v38, %v195_v34 }
  0x69   :  { %v389_v30 = vadd.f32 %v261_v27, %v133_v23  ;;  %v875_v31 = vcombine.high %v610_v28, %v610_v28  ;;  %v611_v32 = vld [vmem:[#allocation2 + $0x8] sm:$0xff]  ;;  %918 = vmatprep.subr.bf16.mxu1 %v508_v24  ;;  %v484_v35 = vpack.c.bf16 %v357_v25, %v356_v21  ;;  %v874_v41 = vcombine.low %v610_v28, %v610_v28  ;;  %v227_v44 = vld [vmem:[#allocation5 + $0x3f8] sm:$0xff]  ;;  %v354_v45 = vld [vmem:[#allocation7 + $0x3f0] sm:$0xff] }
  0x6a   :  { %v877_v36 = vcombine.high %v611_v32, %v611_v32  ;;  %v355_v46 = vld [vmem:[#allocation7 + $0x3f8] sm:$0xff]  ;;  %v876_v47 = vcombine.low %v611_v32, %v611_v32  ;;  %v482_v48 = vadd.f32 %v354_v45, %v226_v39  ;;  %v178_v50 = vld [vmem:[#allocation5 + $0x270] sm:$0xff]  ;;  %v531_v53 = vpack.c.bf16 %v451_v43, %v450_v42  ;;  %v192_v62 = vld [vmem:[#allocation5 + $0x2e0] sm:$0xff] }
  0x6b   :  { %v500_v40 = vpack.c.bf16 %v389_v30, %v388_v29  ;;  %680 = vmatprep.mubr.bf16.mxu0 %v875_v31  ;;  %897 = vmatpush3.bf16.msra.mxu0 %v484_v35  ;;  %v483_v49 = vadd.f32 %v355_v46, %v227_v44  ;;  %v179_v51 = vld [vmem:[#allocation5 + $0x278] sm:$0xff]  ;;  %v306_v52 = vld [vmem:[#allocation7 + $0x270] sm:$0xff]  ;;  %v193_v1 = vld [vmem:[#allocation5 + $0x2e8] sm:$0xff] }
  0x6c   :  { %720 = vmatprep.mubr.bf16.mxu1 %v877_v36  ;;  %v307_v54 = vld [vmem:[#allocation7 + $0x278] sm:$0xff]  ;;  %v434_v55 = vadd.f32 %v306_v52, %v178_v50  ;;  %v210_v56 = vld [vmem:[#allocation5 + $0x370] sm:$0xff]  ;;  %926 = vmatprep.subr.bf16.mxu0 %v531_v53  ;;  %v320_v2 = vld [vmem:[#allocation7 + $0x2e0] sm:$0xff] }
  0x6d   :  { %919 = vmatpush3.bf16.msra.mxu1 %v500_v40  ;;  %v211_v57 = vld [vmem:[#allocation5 + $0x378] sm:$0xff]  ;;  %v547_v58 = vpack.c.bf16 %v483_v49, %v482_v48  ;;  %v435_v59 = vadd.f32 %v307_v54, %v179_v51  ;;  %v338_v60 = vld [vmem:[#allocation7 + $0x370] sm:$0xff]  ;;  %v321_v3 = vld [vmem:[#allocation7 + $0x2e8] sm:$0xff]  ;;  %v448_v5 = vadd.f32 %v320_v2, %v192_v62 }
  0x6e   :  { %v339_v61 = vld [vmem:[#allocation7 + $0x378] sm:$0xff]  ;;  %681 = vmatmul.mubr.bf16.vlgmr.msra.gmra.mxu0 %v874_v41  ;;  %v466_v63 = vadd.f32 %v338_v60, %v210_v56  ;;  %v449_v6 = vadd.f32 %v321_v3, %v193_v1  ;;  %v224_v7 = vld [vmem:[#allocation5 + $0x3e0] sm:$0xff]  ;;  %v225_v8 = vld [vmem:[#allocation5 + $0x3e8] sm:$0xff] }
  0x6f   :  { %v467_v0 = vadd.f32 %v339_v61, %v211_v57  ;;  %948 = vmatprep.subr.bf16.mxu1 %v547_v58  ;;  %v523_v4 = vpack.c.bf16 %v435_v59, %v434_v55  ;;  %v352_v9 = vld [vmem:[#allocation7 + $0x3e0] sm:$0xff]  ;;  %v353_v11 = vld [vmem:[#allocation7 + $0x3e8] sm:$0xff]  ;;  %v190_v28 = vld [vmem:[#allocation5 + $0x2d0] sm:$0xff] }
  0x70   :  { %721 = vmatmul.mubr.bf16.vlgmr.msra.gmra.mxu1 %v876_v47  ;;  %v480_v12 = vadd.f32 %v352_v9, %v224_v7  ;;  %v176_v13 = vld [vmem:[#allocation5 + $0x260] sm:$0xff]  ;;  %v177_v14 = vld [vmem:[#allocation5 + $0x268] sm:$0xff]  ;;  %v530_v15 = vpack.c.bf16 %v449_v6, %v448_v5  ;;  %v481_v16 = vadd.f32 %v353_v11, %v225_v8  ;;  %v191_v29 = vld [vmem:[#allocation5 + $0x2d8] sm:$0xff] }
  0x71   :  { %v539_v10 = vpack.c.bf16 %v467_v0, %v466_v63  ;;  %927 = vmatpush3.bf16.msra.mxu0 %v523_v4  ;;  %v304_v17 = vld [vmem:[#allocation7 + $0x260] sm:$0xff]  ;;  %v305_v18 = vld [vmem:[#allocation7 + $0x268] sm:$0xff]  ;;  %v318_v30 = vld [vmem:[#allocation7 + $0x2d0] sm:$0xff] }
  0x72   :  { %v208_v19 = vld [vmem:[#allocation5 + $0x360] sm:$0xff]  ;;  %v432_v20 = vadd.f32 %v304_v17, %v176_v13  ;;  %v433_v21 = vadd.f32 %v305_v18, %v177_v14  ;;  %v209_v22 = vld [vmem:[#allocation5 + $0x368] sm:$0xff]  ;;  %928 = vmatprep.subr.bf16.mxu0 %v530_v15  ;;  %v546_v25 = vpack.c.bf16 %v481_v16, %v480_v12  ;;  %v319_v32 = vld [vmem:[#allocation7 + $0x2d8] sm:$0xff]  ;;  %v446_v33 = vadd.f32 %v318_v30, %v190_v28 }
  0x73   :  { %949 = vmatpush3.bf16.msra.mxu1 %v539_v10  ;;  %v336_v23 = vld [vmem:[#allocation7 + $0x360] sm:$0xff]  ;;  %v337_v24 = vld [vmem:[#allocation7 + $0x368] sm:$0xff]  ;;  %v222_v34 = vld [vmem:[#allocation5 + $0x3d0] sm:$0xff]  ;;  %v447_v37 = vadd.f32 %v319_v32, %v191_v29 }
  0x74   :  { %v464_v26 = vadd.f32 %v336_v23, %v208_v19  ;;  %v465_v27 = vadd.f32 %v337_v24, %v209_v22  ;;  %v522_v31 = vpack.c.bf16 %v433_v21, %v432_v20  ;;  %v223_v35 = vld [vmem:[#allocation5 + $0x3d8] sm:$0xff]  ;;  %950 = vmatprep.subr.bf16.mxu1 %v546_v25  ;;  %v350_v38 = vld [vmem:[#allocation7 + $0x3d0] sm:$0xff]  ;;  %v188_v55 = vld [vmem:[#allocation5 + $0x2c0] sm:$0xff] }
  0x75   :  { %v351_v39 = vld [vmem:[#allocation7 + $0x3d8] sm:$0xff]  ;;  %v174_v40 = vld [vmem:[#allocation5 + $0x250] sm:$0xff]  ;;  %v478_v41 = vadd.f32 %v350_v38, %v222_v34  ;;  %v529_v46 = vpack.c.bf16 %v447_v37, %v446_v33  ;;  %v189_v56 = vld [vmem:[#allocation5 + $0x2c8] sm:$0xff] }
  0x76   :  { %v538_v36 = vpack.c.bf16 %v465_v27, %v464_v26  ;;  %929 = vmatpush3.bf16.msra.mxu0 %v522_v31  ;;  %v479_v42 = vadd.f32 %v351_v39, %v223_v35  ;;  %v175_v43 = vld [vmem:[#allocation5 + $0x258] sm:$0xff]  ;;  %v302_v44 = vld [vmem:[#allocation7 + $0x250] sm:$0xff]  ;;  %v316_v59 = vld [vmem:[#allocation7 + $0x2c0] sm:$0xff] }
  0x77   :  { %v303_v45 = vld [vmem:[#allocation7 + $0x258] sm:$0xff]  ;;  %v430_v47 = vadd.f32 %v302_v44, %v174_v40  ;;  %v206_v49 = vld [vmem:[#allocation5 + $0x350] sm:$0xff]  ;;  %930 = vmatprep.subr.bf16.mxu0 %v529_v46  ;;  %v317_v60 = vld [vmem:[#allocation7 + $0x2c8] sm:$0xff]  ;;  %v444_v62 = vadd.f32 %v316_v59, %v188_v55 }
  0x78   :  { %951 = vmatpush3.bf16.msra.mxu1 %v538_v36  ;;  %v431_v48 = vadd.f32 %v303_v45, %v175_v43  ;;  %v207_v50 = vld [vmem:[#allocation5 + $0x358] sm:$0xff]  ;;  %v334_v51 = vld [vmem:[#allocation7 + $0x350] sm:$0xff]  ;;  %v545_v52 = vpack.c.bf16 %v479_v42, %v478_v41  ;;  %v220_v61 = vld [vmem:[#allocation5 + $0x3c0] sm:$0xff]  ;;  %v445_v63 = vadd.f32 %v317_v60, %v189_v56 }
  0x79   :  { %v335_v53 = vld [vmem:[#allocation7 + $0x358] sm:$0xff]  ;;  %v462_v54 = vadd.f32 %v334_v51, %v206_v49  ;;  %v221_v0 = vld [vmem:[#allocation5 + $0x3c8] sm:$0xff]  ;;  %v348_v1 = vld [vmem:[#allocation7 + $0x3c0] sm:$0xff] }
  0x7a   :  { %v521_v57 = vpack.c.bf16 %v431_v48, %v430_v47  ;;  %v463_v58 = vadd.f32 %v335_v53, %v207_v50  ;;  %952 = vmatprep.subr.bf16.mxu1 %v545_v52  ;;  %v349_v2 = vld [vmem:[#allocation7 + $0x3c8] sm:$0xff]  ;;  %v476_v4 = vadd.f32 %v348_v1, %v220_v61  ;;  %v172_v6 = vld [vmem:[#allocation5 + $0x240] sm:$0xff]  ;;  %v528_v9 = vpack.c.bf16 %v445_v63, %v444_v62  ;;  %v186_v18 = vld [vmem:[#allocation5 + $0x2b0] sm:$0xff] }
  0x7b   :  { %v477_v5 = vadd.f32 %v349_v2, %v221_v0  ;;  %v173_v7 = vld [vmem:[#allocation5 + $0x248] sm:$0xff]  ;;  %v300_v8 = vld [vmem:[#allocation7 + $0x240] sm:$0xff]  ;;  %v187_v21 = vld [vmem:[#allocation5 + $0x2b8] sm:$0xff] }
  0x7c   :  { %931 = vmatpush3.bf16.msra.mxu0 %v521_v57  ;;  %v537_v3 = vpack.c.bf16 %v463_v58, %v462_v54  ;;  %v301_v10 = vld [vmem:[#allocation7 + $0x248] sm:$0xff]  ;;  %v428_v11 = vadd.f32 %v300_v8, %v172_v6  ;;  %v204_v12 = vld [vmem:[#allocation5 + $0x340] sm:$0xff]  ;;  %v314_v22 = vld [vmem:[#allocation7 + $0x2b0] sm:$0xff] }
  0x7d   :  { %v205_v13 = vld [vmem:[#allocation5 + $0x348] sm:$0xff]  ;;  %v544_v14 = vpack.c.bf16 %v477_v5, %v476_v4  ;;  %v429_v15 = vadd.f32 %v301_v10, %v173_v7  ;;  %v332_v16 = vld [vmem:[#allocation7 + $0x340] sm:$0xff]  ;;  %932 = vmatprep.subr.bf16.mxu0 %v528_v9  ;;  %v315_v23 = vld [vmem:[#allocation7 + $0x2b8] sm:$0xff]  ;;  %v442_v25 = vadd.f32 %v314_v22, %v186_v18 }
  0x7e   :  { %953 = vmatpush3.bf16.msra.mxu1 %v537_v3  ;;  %v333_v17 = vld [vmem:[#allocation7 + $0x348] sm:$0xff]  ;;  %v460_v19 = vadd.f32 %v332_v16, %v204_v12  ;;  %v443_v26 = vadd.f32 %v315_v23, %v187_v21  ;;  %v218_v27 = vld [vmem:[#allocation5 + $0x3b0] sm:$0xff]  ;;  %v219_v28 = vld [vmem:[#allocation5 + $0x3b8] sm:$0xff] }
  0x7f   :  { %v461_v20 = vadd.f32 %v333_v17, %v205_v13  ;;  %954 = vmatprep.subr.bf16.mxu1 %v544_v14  ;;  %v520_v24 = vpack.c.bf16 %v429_v15, %v428_v11  ;;  %v346_v29 = vld [vmem:[#allocation7 + $0x3b0] sm:$0xff]  ;;  %v347_v31 = vld [vmem:[#allocation7 + $0x3b8] sm:$0xff]  ;;  %v184_v48 = vld [vmem:[#allocation5 + $0x2a0] sm:$0xff] }
  0x80   :  { %v474_v32 = vadd.f32 %v346_v29, %v218_v27  ;;  %v170_v33 = vld [vmem:[#allocation5 + $0x230] sm:$0xff]  ;;  %v171_v34 = vld [vmem:[#allocation5 + $0x238] sm:$0xff]  ;;  %v527_v35 = vpack.c.bf16 %v443_v26, %v442_v25  ;;  %v475_v36 = vadd.f32 %v347_v31, %v219_v28  ;;  %v185_v49 = vld [vmem:[#allocation5 + $0x2a8] sm:$0xff] }
  0x81   :  { %v536_v30 = vpack.c.bf16 %v461_v20, %v460_v19  ;;  %933 = vmatpush3.bf16.msra.mxu0 %v520_v24  ;;  %v298_v37 = vld [vmem:[#allocation7 + $0x230] sm:$0xff]  ;;  %v299_v38 = vld [vmem:[#allocation7 + $0x238] sm:$0xff]  ;;  %v312_v50 = vld [vmem:[#allocation7 + $0x2a0] sm:$0xff] }
  0x82   :  { %v202_v39 = vld [vmem:[#allocation5 + $0x330] sm:$0xff]  ;;  %v426_v40 = vadd.f32 %v298_v37, %v170_v33  ;;  %v427_v41 = vadd.f32 %v299_v38, %v171_v34  ;;  %v203_v42 = vld [vmem:[#allocation5 + $0x338] sm:$0xff]  ;;  %934 = vmatprep.subr.bf16.mxu0 %v527_v35  ;;  %v543_v45 = vpack.c.bf16 %v475_v36, %v474_v32  ;;  %v313_v52 = vld [vmem:[#allocation7 + $0x2a8] sm:$0xff]  ;;  %v440_v53 = vadd.f32 %v312_v50, %v184_v48 }
  0x83   :  { %955 = vmatpush3.bf16.msra.mxu1 %v536_v30  ;;  %v330_v43 = vld [vmem:[#allocation7 + $0x330] sm:$0xff]  ;;  %v331_v44 = vld [vmem:[#allocation7 + $0x338] sm:$0xff]  ;;  %v216_v54 = vld [vmem:[#allocation5 + $0x3a0] sm:$0xff]  ;;  %v441_v57 = vadd.f32 %v313_v52, %v185_v49 }
  0x84   :  { %v458_v46 = vadd.f32 %v330_v43, %v202_v39  ;;  %v459_v47 = vadd.f32 %v331_v44, %v203_v42  ;;  %v519_v51 = vpack.c.bf16 %v427_v41, %v426_v40  ;;  %v217_v55 = vld [vmem:[#allocation5 + $0x3a8] sm:$0xff]  ;;  %956 = vmatprep.subr.bf16.mxu1 %v543_v45  ;;  %v344_v58 = vld [vmem:[#allocation7 + $0x3a0] sm:$0xff]  ;;  %v182_v11 = vld [vmem:[#allocation5 + $0x290] sm:$0xff] }
  0x85   :  { %v345_v59 = vld [vmem:[#allocation7 + $0x3a8] sm:$0xff]  ;;  %v168_v60 = vld [vmem:[#allocation5 + $0x220] sm:$0xff]  ;;  %v472_v61 = vadd.f32 %v344_v58, %v216_v54  ;;  %v526_v2 = vpack.c.bf16 %v441_v57, %v440_v53  ;;  %v183_v12 = vld [vmem:[#allocation5 + $0x298] sm:$0xff] }
  0x86   :  { %v535_v56 = vpack.c.bf16 %v459_v47, %v458_v46  ;;  %935 = vmatpush3.bf16.msra.mxu0 %v519_v51  ;;  %v473_v62 = vadd.f32 %v345_v59, %v217_v55  ;;  %v169_v63 = vld [vmem:[#allocation5 + $0x228] sm:$0xff]  ;;  %v296_v0 = vld [vmem:[#allocation7 + $0x220] sm:$0xff]  ;;  %v310_v15 = vld [vmem:[#allocation7 + $0x290] sm:$0xff] }
  0x87   :  { %v297_v1 = vld [vmem:[#allocation7 + $0x228] sm:$0xff]  ;;  %v424_v3 = vadd.f32 %v296_v0, %v168_v60  ;;  %v200_v5 = vld [vmem:[#allocation5 + $0x320] sm:$0xff]  ;;  %936 = vmatprep.subr.bf16.mxu0 %v526_v2  ;;  %v311_v16 = vld [vmem:[#allocation7 + $0x298] sm:$0xff]  ;;  %v438_v18 = vadd.f32 %v310_v15, %v182_v11  ;;  %v1154_v15 = vmov 0.0  }
  0x88   :  { %957 = vmatpush3.bf16.msra.mxu1 %v535_v56  ;;  %v425_v4 = vadd.f32 %v297_v1, %v169_v63  ;;  %v201_v6 = vld [vmem:[#allocation5 + $0x328] sm:$0xff]  ;;  %v328_v7 = vld [vmem:[#allocation7 + $0x320] sm:$0xff]  ;;  %v542_v8 = vpack.c.bf16 %v473_v62, %v472_v61  ;;  %v214_v17 = vld [vmem:[#allocation5 + $0x390] sm:$0xff]  ;;  %v439_v19 = vadd.f32 %v311_v16, %v183_v12 }
  0x89   :  { %v329_v9 = vld [vmem:[#allocation7 + $0x328] sm:$0xff]  ;;  %v456_v10 = vadd.f32 %v328_v7, %v200_v5  ;;  %v215_v20 = vld [vmem:[#allocation5 + $0x398] sm:$0xff]  ;;  %v342_v21 = vld [vmem:[#allocation7 + $0x390] sm:$0xff] }
  0x8a   :  { %v518_v13 = vpack.c.bf16 %v425_v4, %v424_v3  ;;  %v457_v14 = vadd.f32 %v329_v9, %v201_v6  ;;  %958 = vmatprep.subr.bf16.mxu1 %v542_v8  ;;  %v343_v22 = vld [vmem:[#allocation7 + $0x398] sm:$0xff]  ;;  %v470_v24 = vadd.f32 %v342_v21, %v214_v17  ;;  %v166_v26 = vld [vmem:[#allocation5 + $0x210] sm:$0xff]  ;;  %v525_v29 = vpack.c.bf16 %v439_v19, %v438_v18  ;;  %v180_v38 = vld [vmem:[#allocation5 + $0x280] sm:$0xff] }
  0x8b   :  { %v471_v25 = vadd.f32 %v343_v22, %v215_v20  ;;  %v167_v27 = vld [vmem:[#allocation5 + $0x218] sm:$0xff]  ;;  %v294_v28 = vld [vmem:[#allocation7 + $0x210] sm:$0xff]  ;;  %v181_v41 = vld [vmem:[#allocation5 + $0x288] sm:$0xff] }
  0x8c   :  { %937 = vmatpush3.bf16.msra.mxu0 %v518_v13  ;;  %v534_v23 = vpack.c.bf16 %v457_v14, %v456_v10  ;;  %v295_v30 = vld [vmem:[#allocation7 + $0x218] sm:$0xff]  ;;  %v422_v31 = vadd.f32 %v294_v28, %v166_v26  ;;  %v198_v32 = vld [vmem:[#allocation5 + $0x310] sm:$0xff]  ;;  %v308_v42 = vld [vmem:[#allocation7 + $0x280] sm:$0xff] }
  0x8d   :  { %v199_v33 = vld [vmem:[#allocation5 + $0x318] sm:$0xff]  ;;  %v541_v34 = vpack.c.bf16 %v471_v25, %v470_v24  ;;  %v423_v35 = vadd.f32 %v295_v30, %v167_v27  ;;  %v326_v36 = vld [vmem:[#allocation7 + $0x310] sm:$0xff]  ;;  %938 = vmatprep.subr.bf16.mxu0 %v525_v29  ;;  %v309_v43 = vld [vmem:[#allocation7 + $0x288] sm:$0xff]  ;;  %v436_v45 = vadd.f32 %v308_v42, %v180_v38 }
  0x8e   :  { %959 = vmatpush3.bf16.msra.mxu1 %v534_v23  ;;  %v327_v37 = vld [vmem:[#allocation7 + $0x318] sm:$0xff]  ;;  %v454_v39 = vadd.f32 %v326_v36, %v198_v32  ;;  %v437_v46 = vadd.f32 %v309_v43, %v181_v41  ;;  %v212_v47 = vld [vmem:[#allocation5 + $0x380] sm:$0xff]  ;;  %v213_v48 = vld [vmem:[#allocation5 + $0x388] sm:$0xff] }
  0x8f   :  { %v455_v40 = vadd.f32 %v327_v37, %v199_v33  ;;  %960 = vmatprep.subr.bf16.mxu1 %v541_v34  ;;  %v517_v44 = vpack.c.bf16 %v423_v35, %v422_v31  ;;  %v340_v49 = vld [vmem:[#allocation7 + $0x380] sm:$0xff]  ;;  %v341_v51 = vld [vmem:[#allocation7 + $0x388] sm:$0xff]  ;;  %v612_v4 = vld [vmem:[#allocation2 + $0x10] sm:$0xff] }
  0x90   :  { %v468_v52 = vadd.f32 %v340_v49, %v212_v47  ;;  %v164_v53 = vld [vmem:[#allocation5 + $0x200] sm:$0xff]  ;;  %v165_v54 = vld [vmem:[#allocation5 + $0x208] sm:$0xff]  ;;  %v524_v55 = vpack.c.bf16 %v437_v46, %v436_v45  ;;  %v469_v56 = vadd.f32 %v341_v51, %v213_v48  ;;  %v613_v5 = vld [vmem:[#allocation2 + $0x18] sm:$0xff]  ;;  %v879_v7 = vcombine.high %v612_v4, %v612_v4 }
  0x91   :  { %v533_v50 = vpack.c.bf16 %v455_v40, %v454_v39  ;;  %939 = vmatpush3.bf16.msra.mxu0 %v517_v44  ;;  %v292_v57 = vld [vmem:[#allocation7 + $0x200] sm:$0xff]  ;;  %v293_v58 = vld [vmem:[#allocation7 + $0x208] sm:$0xff]  ;;  %v878_v9 = vcombine.low %v612_v4, %v612_v4  ;;  %v881_v10 = vcombine.high %v613_v5, %v613_v5  ;;  %v880_v11 = vcombine.low %v613_v5, %v613_v5  ;;  %v562_v12 = vld [vmem:[#allocation8 + $0x70] sm:$0xff] }
  0x92   :  { %v196_v59 = vld [vmem:[#allocation5 + $0x300] sm:$0xff]  ;;  %v420_v60 = vadd.f32 %v292_v57, %v164_v53  ;;  %v421_v61 = vadd.f32 %v293_v58, %v165_v54  ;;  %v197_v62 = vld [vmem:[#allocation5 + $0x308] sm:$0xff]  ;;  %940 = vmatprep.subr.bf16.mxu0 %v524_v55  ;;  %v540_v1 = vpack.c.bf16 %v469_v56, %v468_v52  ;;  %760 = vmatprep.mubr.bf16.mxu0 %v879_v7  ;;  %v563_v13 = vld [vmem:[#allocation8 + $0x78] sm:$0xff] }
  0x93   :  { %961 = vmatpush3.bf16.msra.mxu1 %v533_v50  ;;  %v324_v63 = vld [vmem:[#allocation7 + $0x300] sm:$0xff]  ;;  %v325_v0 = vld [vmem:[#allocation7 + $0x308] sm:$0xff]  ;;  %800 = vmatprep.mubr.bf16.mxu1 %v881_v10  ;;  %v578_v14 = vld [vmem:[#allocation10 + $0x70] sm:$0xff] }
  0x94   :  { %v452_v2 = vadd.f32 %v324_v63, %v196_v59  ;;  %v453_v3 = vadd.f32 %v325_v0, %v197_v62  ;;  %v516_v6 = vpack.c.bf16 %v421_v61, %v420_v60  ;;  %962 = vmatprep.subr.bf16.mxu1 %v540_v1  ;;  %v579_v16 = vld [vmem:[#allocation10 + $0x78] sm:$0xff]  ;;  %v594_v17 = vadd.f32 %v578_v14, %v562_v12  ;;  %v560_v18 = vld [vmem:[#allocation8 + $0x60] sm:$0xff]  ;;  %v561_v19 = vld [vmem:[#allocation8 + $0x68] sm:$0xff] }
  0x95   :  { %v595_v20 = vadd.f32 %v579_v16, %v563_v13  ;;  %v576_v21 = vld [vmem:[#allocation10 + $0x60] sm:$0xff]  ;;  %v577_v22 = vld [vmem:[#allocation10 + $0x68] sm:$0xff]  ;;  %v558_v27 = vld [vmem:[#allocation8 + $0x50] sm:$0xff]  ;;  %v615_v13 = vlaneseq }
  0x96   :  { %v532_v8 = vpack.c.bf16 %v453_v3, %v452_v2  ;;  %941 = vmatpush3.bf16.msra.mxu0 %v516_v6  ;;  %v592_v23 = vadd.f32 %v576_v21, %v560_v18  ;;  %v593_v24 = vadd.f32 %v577_v22, %v561_v19  ;;  %v559_v28 = vld [vmem:[#allocation8 + $0x58] sm:$0xff]  ;;  %v574_v29 = vld [vmem:[#allocation10 + $0x50] sm:$0xff]  ;;  %v556_v34 = vld [vmem:[#allocation8 + $0x40] sm:$0xff] }
  0x97   :  { %979 = vmatprep.subr.bf16.mxu0 %v1154_v15  ;;  %v603_v25 = vpack.c.bf16 %v595_v20, %v594_v17  ;;  %v575_v30 = vld [vmem:[#allocation10 + $0x58] sm:$0xff]  ;;  %v590_v31 = vadd.f32 %v574_v29, %v558_v27  ;;  %v557_v35 = vld [vmem:[#allocation8 + $0x48] sm:$0xff]  ;;  %v572_v36 = vld [vmem:[#allocation10 + $0x40] sm:$0xff]  ;;  %v616_v14 = vshrl.u32 %v615_v13, 7 }
  0x98   :  { %963 = vmatpush3.bf16.msra.mxu1 %v532_v8  ;;  %v602_v26 = vpack.c.bf16 %v593_v24, %v592_v23  ;;  %v591_v32 = vadd.f32 %v575_v30, %v559_v28  ;;  %v573_v37 = vld [vmem:[#allocation10 + $0x48] sm:$0xff]  ;;  %v588_v38 = vadd.f32 %v572_v36, %v556_v34  ;;  %v554_v41 = vld [vmem:[#allocation8 + $0x30] sm:$0xff]  ;;  %v555_v42 = vld [vmem:[#allocation8 + $0x38] sm:$0xff] }
  0x99   :  { %761 = vmatmul.mubr.bf16.vlgmr.msra.gmra.mxu0 %v878_v9  ;;  %v589_v39 = vadd.f32 %v573_v37, %v557_v35  ;;  %v570_v43 = vld [vmem:[#allocation10 + $0x30] sm:$0xff]  ;;  %v571_v44 = vld [vmem:[#allocation10 + $0x38] sm:$0xff]  ;;  %v552_v48 = vld [vmem:[#allocation8 + $0x20] sm:$0xff] }
  0x9a   :  { %980 = vmatpush3.bf16.msra.mxu0 %v603_v25  ;;  %v601_v33 = vpack.c.bf16 %v591_v32, %v590_v31  ;;  %v586_v45 = vadd.f32 %v570_v43, %v554_v41  ;;  %v587_v46 = vadd.f32 %v571_v44, %v555_v42  ;;  %v553_v49 = vld [vmem:[#allocation8 + $0x28] sm:$0xff]  ;;  %v568_v50 = vld [vmem:[#allocation10 + $0x20] sm:$0xff]  ;;  %v550_v55 = vld [vmem:[#allocation8 + $0x10] sm:$0xff]  ;;  %995 = vmatprep.mubr.msk.bf16.mxu0 %vm1155_vm0, %v1154_v15 }
  0x9b   :  { %801 = vmatmul.mubr.bf16.vlgmr.msra.gmra.mxu1 %v880_v11  ;;  %981 = vmatprep.subr.bf16.mxu0 %v1154_v15  ;;  %v600_v40 = vpack.c.bf16 %v589_v39, %v588_v38  ;;  %v569_v51 = vld [vmem:[#allocation10 + $0x28] sm:$0xff]  ;;  %v584_v52 = vadd.f32 %v568_v50, %v552_v48  ;;  %v551_v56 = vld [vmem:[#allocation8 + $0x18] sm:$0xff]  ;;  %v566_v57 = vld [vmem:[#allocation10 + $0x10] sm:$0xff] }
  0x9c   :  { %v599_v47 = vpack.c.bf16 %v587_v46, %v586_v45  ;;  %v585_v53 = vadd.f32 %v569_v51, %v553_v49  ;;  %v567_v58 = vld [vmem:[#allocation10 + $0x18] sm:$0xff]  ;;  %v582_v59 = vadd.f32 %v566_v57, %v550_v55  ;;  %v548_v62 = vld [vmem:[#allocation8] sm:$0xff]  ;;  %v549_v63 = vld [vmem:[#allocation8 + $0x8] sm:$0xff] }
  0x9d   :  { %v583_v60 = vadd.f32 %v567_v58, %v551_v56  ;;  %v564_v0 = vld [vmem:[#allocation10] sm:$0xff]  ;;  %v565_v1 = vld [vmem:[#allocation10 + $0x8] sm:$0xff] }
  0x9e   :  { %982 = vmatpush3.bf16.msra.mxu0 %v602_v26  ;;  %v598_v54 = vpack.c.bf16 %v585_v53, %v584_v52  ;;  %v580_v2 = vadd.f32 %v564_v0, %v548_v62  ;;  %v581_v3 = vadd.f32 %v565_v1, %v549_v63  ;;  %v604_v16 = vld [vmem:[%s1261_s3] sm:$0x1] }
  0x9f   :  { %983 = vmatprep.subr.bf16.mxu0 %v1154_v15  ;;  %v597_v61 = vpack.c.bf16 %v583_v60, %v582_v59  ;;  %v605_v17 = vld [vmem:[%s1262_s4] sm:$0x1] }
  0xa0   :  { %v596_v4 = vpack.c.bf16 %v581_v3, %v580_v2  ;;  %v606_v18 = vadd.f32 %v605_v17, %v604_v16  ;;  %v607_v38 = vld [vmem:[%s1265_s7] sm:$0x1] }
  0xa1   :  { %v608_v39 = vld [vmem:[%s1266_s8] sm:$0x1] }
  0xa2   :  { %984 = vmatpush3.bf16.msra.mxu0 %v601_v33 }
  0xa3   :  { %985 = vmatprep.subr.bf16.mxu0 %v1154_v15 }
  0xa6   :  { %986 = vmatpush3.bf16.msra.mxu0 %v600_v40  ;;  %v609_v40 = vadd.f32 %v608_v39, %v607_v38 }
  0xa7   :  { %987 = vmatprep.subr.bf16.mxu0 %v1154_v15 }
  0xaa   :  { %988 = vmatpush3.bf16.msra.mxu0 %v599_v47 }
  0xab   :  { %989 = vmatprep.subr.bf16.mxu0 %v1154_v15 }
  0xae   :  { %990 = vmatpush3.bf16.msra.mxu0 %v598_v54 }
  0xaf   :  { %991 = vmatprep.subr.bf16.mxu0 %v1154_v15 }
  0xb2   :  { %992 = vmatpush3.bf16.msra.mxu0 %v597_v61 }
  0xb3   :  { %993 = vmatprep.subr.bf16.mxu0 %v1154_v15  ;;  %v617_v15 = vsub.s32 0, %v616_v14 }
  0xb5   :  { %v618_v19 = vrot.slane %v606_v18, %v617_v15  ;;  %v814_v41 = vrot.slane %v609_v40, %v617_v15 }
  0xb6   :  { %994 = vmatpush3.bf16.msra.mxu0 %v596_v4 }
 0x12e   :  { %v898_v5 = vpop.f32.mrf.mxu0 }
 0x130   :  { %v920_v6 = vpop.f32.mrf.mxu1  ;;  %v899_v7 = vpop.f32.mrf.mxu0 }
 0x131   :  { %v900_v20 = vadd.f32 %v899_v7, %v898_v5 }
 0x132   :  { %v921_v8 = vpop.f32.mrf.mxu1  ;;  %v901_v9 = vpop.f32.mrf.mxu0 }
 0x133   :  { %v683_v21 = vadd.f32 %v900_v20, %v618_v19  ;;  %v922_v22 = vadd.f32 %v921_v8, %v920_v6 }
 0x134   :  { %v923_v10 = vpop.f32.mrf.mxu1  ;;  %v902_v11 = vpop.f32.mrf.mxu0 }
 0x135   :  { %v723_v26 = vadd.f32 %v922_v22, %v683_v21 }
 0x136   :  { %v924_v12 = vpop.f32.mrf.mxu1 }
 0x159   :  { %v942_v23 = vpop.f32.mrf.mxu0 }
 0x15b   :  { %v964_v24 = vpop.f32.mrf.mxu1  ;;  %v943_v25 = vpop.f32.mrf.mxu0 }
 0x15c   :  { %v944_v27 = vadd.f32 %v943_v25, %v942_v23 }
 0x15d   :  { %v965_v28 = vpop.f32.mrf.mxu1  ;;  %v945_v29 = vpop.f32.mrf.mxu0 }
 0x15e   :  { %v763_v30 = vadd.f32 %v944_v27, %v723_v26  ;;  %v966_v31 = vadd.f32 %v965_v28, %v964_v24 }
 0x15f   :  { %v967_v32 = vpop.f32.mrf.mxu1  ;;  %v946_v33 = vpop.f32.mrf.mxu0 }
 0x160   :  { %v803_v34 = vadd.f32 %v966_v31, %v763_v30 }
 0x161   :  { %v968_v35 = vpop.f32.mrf.mxu1 }
 0x162   :  { %1017 = vtanh.f32 %v803_v34 }
 0x16f   :  { %v1018_v36 = vpop.eup %1017 }
 0x170   :  { %v809_v37 = vpack.c.bf16 %v1018_v36, %v1018_v36 }
 0x172   :  { %996 = vmatmul.mubr.bf16.vlgmr.msra.gmra.mxu0 %v809_v37 }
 0x232   :  { %v850_v42 = vpop.f32.mrf.mxu0 }
 0x233   :  { %v851_v43 = vadd.f32 %v850_v42, %v814_v41 }
 0x234   :  { %v997_v44 = vpop.f32.mrf.mxu0 }
 0x235   :  { %856 = vst [vmem:[#allocation11] sm:$0xff] %v851_v43 }
 0x236   :  { %v853_v45 = vpop.f32.mrf.mxu0 }
 0x237   :  { %1130 = shalt.err (!%p1127_p1)
}
 0x238   :  { %866 = dma.vmem_to_hbm [thread:$0]  %s864_s17, 128, %s1267_s9, [#allocation4]   ;;  %v998_v46 = vpop.f32.mrf.mxu0 }
 0x239   :  { %1145 = dma.done.wait [#allocation4], 128  }
 0x23a   :  { %1146 = vsyncadd [#allocation4], 4294967168 }
 0x23b   :  { %870 = vsyncpa [#allocation3], 1 }
 0x23c   :  { %871 = vsyncpa [#allocation6], 1 }
 0x23d   :  { %872 = vsyncpa [#allocation9], 1 }
 0x23e   :  { %873 = vsyncpa [#allocation4], 1 }

</bundles_post_ra>
